<compile_context>
chip_gen: v7x
topology: tpu7x:2x2x1
jax: 0.10.0
libtpu: 0.0.40
codegen_flags: <defaults>
</compile_context>

<pallas_src>
import functools
from typing import NamedTuple

import jax
import jax.numpy as jnp
from jax.experimental import pallas as pl
from jax.experimental.pallas import tpu as pltpu


def _round_up(x, m):
    return ((x + m - 1) // m) * m


def _cdiv(a, b):
    return (a + b - 1) // b


# --------------------------------------------------------------------------
# Kernel
# --------------------------------------------------------------------------
def _mlp_kernel(x_ref, wgu_ref, wd_ref, o_ref, acc_ref, *, ti):
    # x_ref:   (tm, H)     bf16 token tile (resident across k)
    # wgu_ref: (H, 2*ti)   fused [gate_k | up_k] weight tile for chunk k
    # wd_ref:  (ti, H)     down_proj weight tile for chunk k
    # o_ref:   (tm, H)     bf16 output tile (resident across k)
    # acc_ref: (tm, H) f32 VMEM accumulator
    k = pl.program_id(1)

    @pl.when(k == 0)
    def _():
        acc_ref[...] = jnp.zeros_like(acc_ref)

    x = x_ref[...]
    # Ref slices are zero-cost views: two MXU dots, no fused (tm, 2*ti) f32
    # temporary in VMEM, single fused weight DMA stream preserved.
    g = jnp.dot(x, wgu_ref[:, :ti], preferred_element_type=jnp.float32)
    u = jnp.dot(x, wgu_ref[:, ti:], preferred_element_type=jnp.float32)
    # SiLU (Qwen2 hidden_act == "silu"): g * sigmoid(g), in f32.
    h = (g * jax.nn.sigmoid(g)) * u
    acc_ref[...] += jnp.dot(h.astype(jnp.bfloat16), wd_ref[...],
                            preferred_element_type=jnp.float32)

    @pl.when(k == pl.num_programs(1) - 1)
    def _():
        o_ref[...] = acc_ref[...].astype(o_ref.dtype)


# --------------------------------------------------------------------------
# One-time weight preparation (model-load time, not per forward)
# --------------------------------------------------------------------------
class Qwen2MLPWeights(NamedTuple):
    wgu: jax.Array   # [H, 2*I]; columns [k*2*ti:(k+1)*2*ti] = [gate_k | up_k]
    wd_t: jax.Array  # [I, H]    (down_proj transposed)
    ti: int          # intermediate-dim tile the packing is coupled to


def prepare_qwen2_mlp_weights(w_gate, w_up, w_down, *, ti,
                              dtype=jnp.bfloat16) -> Qwen2MLPWeights:
    """w_gate/w_up: [I, H] (PyTorch nn.Linear layout), w_down: [H, I]."""
    I, H = w_gate.shape
    assert w_up.shape == (I, H) and w_down.shape == (H, I)
    assert ti % 128 == 0, "ti must be a multiple of 128"
    assert I % ti == 0, "intermediate_size must be a multiple of ti"
    nk = I // ti
    wg_t = w_gate.T.astype(dtype)   # [H, I]
    wu_t = w_up.T.astype(dtype)     # [H, I]
    wgu = jnp.concatenate(
        [wg_t.reshape(H, nk, ti), wu_t.reshape(H, nk, ti)], axis=2
    ).reshape(H, 2 * I)
    wd_t = w_down.T.astype(dtype)   # [I, H]
    return Qwen2MLPWeights(wgu=wgu, wd_t=wd_t, ti=ti)


# --------------------------------------------------------------------------
# Generation-aware sizing helpers
# --------------------------------------------------------------------------
def _vmem_capacity_bytes():
    """Physical VMEM per TensorCore; conservative 64 MiB fallback (v7x)."""
    try:
        info = pltpu.get_tpu_info()
        cap = getattr(info, "vmem_capacity_bytes", None)
        if cap is not None and int(cap) > 0:
            return int(cap)
    except Exception:
        pass
    return 64 * 1024 * 1024


def _working_set_bytes(tm, H, ti, out_itemsize):
    # Double-buffered input/output tiles + f32 accumulator (bf16 weights/x).
    return (2 * tm * H * 2              # x tiles
            + 2 * H * 2 * ti * 2        # fused gate/up weight tiles
            + 2 * ti * H * 2            # down weight tiles
            + 2 * tm * H * out_itemsize # output tiles (bf16)
            + tm * H * 4)               # f32 accumulator


def _select_tm(H, ti, vmem_budget, out_itemsize):
    for tm in (1024, 768, 512, 384, 256, 192, 128, 64, 32, 16):
        if _working_set_bytes(tm, H, ti, out_itemsize) <= vmem_budget:
            return tm
    return 16


# --------------------------------------------------------------------------
# Forward wrapper
# --------------------------------------------------------------------------
def qwen2_mlp(x, weights: Qwen2MLPWeights, *, tm=None):
    """x: [B, S, H]. Returns [B, S, H] in x.dtype."""
    B, S, H = x.shape
    wgu, wd_t, ti = weights.wgu, weights.wd_t, weights.ti
    I = wd_t.shape[0]
    # Packed-layout consistency checks (ti is coupled to the wgu packing).
    assert wgu.shape == (H, 2 * I), (wgu.shape, H, I)
    assert wd_t.shape == (I, H)
    assert H % 128 == 0 and ti % 128 == 0 and I % ti == 0
    nk = I // ti

    M = B * S
    out_itemsize = 2  # bf16 kernel output

    # VMEM-derived sizing: ~85% of physical VMEM as the scoped limit, ~90% of
    # that as the budget for the (double-buffered) working-set estimate.
    vmem_cap = _vmem_capacity_bytes()
    vmem_limit = min(int(vmem_cap * 0.85), 112 * 1024 * 1024)
    if tm is None:
        tm = _select_tm(H, ti, int(vmem_limit * 0.9), out_itemsize)

    # Balanced token tiles (avoid padding M up to a multiple of tm).
    tm_cap = max(16, min(tm, _round_up(M, 16)))
    n_tiles = _cdiv(M, tm_cap)
    tm_eff = _round_up(_cdiv(M, n_tiles), 16)
    M_pad = n_tiles * tm_eff

    x2d = x.reshape(M, H).astype(jnp.bfloat16)
    if M_pad != M:
        x2d = jnp.pad(x2d, ((0, M_pad - M), (0, 0)))

    # Weights are re-streamed once per token tile (index maps ignore i).
    weight_bytes = (H * 2 * I + I * H) * 2  # bf16
    cost = pl.CostEstimate(
        flops=6 * M_pad * H * I,            # gate + up + down matmuls
        transcendentals=M_pad * I,          # sigmoid
        bytes_accessed=(M_pad * H * 2                    # x (bf16)
                        + n_tiles * weight_bytes         # weights, per i tile
                        + M_pad * H * out_itemsize),     # output (bf16)
    )

    out = pl.pallas_call(
        functools.partial(_mlp_kernel, ti=ti),
        out_shape=jax.ShapeDtypeStruct((M_pad, H), jnp.bfloat16),
        grid_spec=pltpu.PrefetchScalarGridSpec(
            num_scalar_prefetch=0,
            grid=(n_tiles, nk),
            in_specs=[
                pl.BlockSpec((tm_eff, H), lambda i, k: (i, 0)),   # x tile
                pl.BlockSpec((H, 2 * ti), lambda i, k: (0, k)),   # [gate_k|up_k]
                pl.BlockSpec((ti, H), lambda i, k: (k, 0)),       # down_k
            ],
            out_specs=pl.BlockSpec((tm_eff, H), lambda i, k: (i, 0)),
            scratch_shapes=[pltpu.VMEM((tm_eff, H), jnp.float32)],
        ),
        compiler_params=pltpu.CompilerParams(
            dimension_semantics=("parallel", "arbitrary"),
            vmem_limit_bytes=vmem_limit,
        ),
        cost_estimate=cost,
    )(x2d, wgu, wd_t)

    return out[:M].reshape(B, S, H).astype(x.dtype)


# --------------------------------------------------------------------------
# Self-test
# --------------------------------------------------------------------------
if __name__ == "__main__":
    # Small Qwen2-like config: hidden_size=128, intermediate_size=256,
    # hidden_act="silu"; input batch=2, seq=8.
    B, S, H, I = 2, 8, 128, 256

    key = jax.random.PRNGKey(0)
    kx, kg, ku, kd = jax.random.split(key, 4)

    x = jax.random.normal(kx, (B, S, H), dtype=jnp.float32)
    # PyTorch nn.Linear weight shapes: gate/up [I, H], down [H, I].
    w_gate = jax.random.normal(kg, (I, H), dtype=jnp.float32) * 0.02
    w_up   = jax.random.normal(ku, (I, H), dtype=jnp.float32) * 0.02
    w_down = jax.random.normal(kd, (H, I), dtype=jnp.float32) * 0.02

    # Keep ti >= 512 at real sizes; clamp for the toy intermediate size.
    ti = min(512, I)
    weights = prepare_qwen2_mlp_weights(w_gate, w_up, w_down, ti=ti)

    out = qwen2_mlp(x, weights)
    out = jax.block_until_ready(out)

    # Reference (plain JAX, same math as the PyTorch forward).
    g_ref = x @ w_gate.T
    u_ref = x @ w_up.T
    ref = (jax.nn.silu(g_ref) * u_ref) @ w_down.T
    assert out.shape == (B, S, H)
    # bf16 weights/activations/output with f32 accumulation -> loose tolerance.
    assert jnp.allclose(out, ref, atol=5e-3, rtol=5e-2), \
        float(jnp.max(jnp.abs(out - ref)))

    print("KERNEL_OK")
</pallas_src>

<mosaic_0001>
module attributes {stable_mosaic.version = 11 : i64} {
  func.func @_mlp_kernel(%arg0: i32, %arg1: i32, %arg2: memref<16x128xbf16, #tpu.memory_space<vmem>>, %arg3: memref<128x512xbf16, #tpu.memory_space<vmem>>, %arg4: memref<256x128xbf16, #tpu.memory_space<vmem>>, %arg5: memref<16x128xbf16, #tpu.memory_space<vmem>>, %arg6: memref<16x128xf32, #tpu.memory_space<vmem>>) attributes {dimension_semantics = [#tpu.dimension_semantics<parallel>, #tpu.dimension_semantics<arbitrary>], iteration_bounds = array<i64: 1, 1>, scalar_prefetch = 0 : i64, scratch_operands = 1 : i64, tpu.core_type = #tpu.core_type<tc>, window_params = [{transform_indices = @transform_0, window_bounds = array<i64: 16, 128>}, {transform_indices = @transform_1, window_bounds = array<i64: 128, 512>}, {transform_indices = @transform_2, window_bounds = array<i64: 256, 128>}, {transform_indices = @transform_3, window_bounds = array<i64: 16, 128>}]} {
    %c0_i32 = arith.constant 0 : i32
    %0 = arith.cmpi eq, %arg1, %c0_i32 : i32
    %1 = arith.extui %0 : i1 to i32
    %c0_i32_0 = arith.constant 0 : i32
    %2 = arith.cmpi ne, %1, %c0_i32_0 : i32
    scf.if %2 {
      %cst_16 = arith.constant 0.000000e+00 : f32
      %24 = vector.broadcast %cst_16 : f32 to vector<16x128xf32>
      %c0_17 = arith.constant 0 : index
      %c0_18 = arith.constant 0 : index
      %25 = vector.load %arg6[%c0_17, %c0_18] : memref<16x128xf32, #tpu.memory_space<vmem>>, vector<16x128xf32>
      tpu.vector_store %arg6[%c0_17, %c0_18], %24 {strides = array<i32>} : memref<16x128xf32, #tpu.memory_space<vmem>>, vector<16x128xf32>,
    } else {
    }
    %c0 = arith.constant 0 : index
    %c0_1 = arith.constant 0 : index
    %3 = vector.load %arg2[%c0, %c0_1] : memref<16x128xbf16, #tpu.memory_space<vmem>>, vector<16x128xbf16>
    %c0_2 = arith.constant 0 : index
    %c0_3 = arith.constant 0 : index
    %4 = vector.load %arg3[%c0_2, %c0_3] : memref<128x512xbf16, #tpu.memory_space<vmem>>, vector<128x256xbf16>
    %cst = arith.constant dense<0.000000e+00> : vector<16x256xf32>
    %5 = tpu.matmul %3, %4, %cst {dimension_numbers = #tpu.dot_dimension_numbers<[1], [0], [0], [1], [0, 0, 1, 1], [], []>} : vector<16x128xbf16>, vector<128x256xbf16>, vector<16x256xf32> -> vector<16x256xf32>
    %c0_4 = arith.constant 0 : index
    %c256 = arith.constant 256 : index
    %6 = vector.load %arg3[%c0_4, %c256] : memref<128x512xbf16, #tpu.memory_space<vmem>>, vector<128x256xbf16>
    %cst_5 = arith.constant dense<0.000000e+00> : vector<16x256xf32>
    %7 = tpu.matmul %3, %6, %cst_5 {dimension_numbers = #tpu.dot_dimension_numbers<[1], [0], [0], [1], [0, 0, 1, 1], [], []>} : vector<16x128xbf16>, vector<128x256xbf16>, vector<16x256xf32> -> vector<16x256xf32>
    %8 = arith.negf %5 : vector<16x256xf32>
    %9 = math.exp %8 : vector<16x256xf32>
    %cst_6 = arith.constant 1.000000e+00 : f32
    %10 = vector.broadcast %cst_6 : f32 to vector<16x256xf32>
    %11 = arith.addf %10, %9 : vector<16x256xf32>
    %12 = arith.divf %10, %11 : vector<16x256xf32>
    %13 = arith.mulf %5, %12 : vector<16x256xf32>
    %14 = arith.mulf %13, %7 : vector<16x256xf32>
    %c0_7 = arith.constant 0 : index
    %c0_8 = arith.constant 0 : index
    %15 = vector.load %arg6[%c0_7, %c0_8] : memref<16x128xf32, #tpu.memory_space<vmem>>, vector<16x128xf32>
    %16 = arith.truncf %14 : vector<16x256xf32> to vector<16x256xbf16>
    %c0_9 = arith.constant 0 : index
    %c0_10 = arith.constant 0 : index
    %17 = vector.load %arg4[%c0_9, %c0_10] : memref<256x128xbf16, #tpu.memory_space<vmem>>, vector<256x128xbf16>
    %cst_11 = arith.constant dense<0.000000e+00> : vector<16x128xf32>
    %18 = tpu.matmul %16, %17, %cst_11 {dimension_numbers = #tpu.dot_dimension_numbers<[1], [0], [0], [1], [0, 0, 1, 1], [], []>} : vector<16x256xbf16>, vector<256x128xbf16>, vector<16x128xf32> -> vector<16x128xf32>
    %19 = arith.addf %15, %18 : vector<16x128xf32>
    %c0_12 = arith.constant 0 : index
    %c0_13 = arith.constant 0 : index
    %20 = vector.load %arg6[%c0_12, %c0_13] : memref<16x128xf32, #tpu.memory_space<vmem>>, vector<16x128xf32>
    tpu.vector_store %arg6[%c0_12, %c0_13], %19 {strides = array<i32>} : memref<16x128xf32, #tpu.memory_space<vmem>>, vector<16x128xf32>,
    %c0_i32_14 = arith.constant 0 : i32
    %21 = arith.cmpi eq, %arg1, %c0_i32_14 : i32
    %22 = arith.extui %21 : i1 to i32
    %c0_i32_15 = arith.constant 0 : i32
    %23 = arith.cmpi ne, %22, %c0_i32_15 : i32
    scf.if %23 {
      %c0_16 = arith.constant 0 : index
      %c0_17 = arith.constant 0 : index
      %24 = vector.load %arg6[%c0_16, %c0_17] : memref<16x128xf32, #tpu.memory_space<vmem>>, vector<16x128xf32>
      %25 = arith.truncf %24 : vector<16x128xf32> to vector<16x128xbf16>
      %c0_18 = arith.constant 0 : index
      %c0_19 = arith.constant 0 : index
      %26 = vector.load %arg5[%c0_18, %c0_19] : memref<16x128xbf16, #tpu.memory_space<vmem>>, vector<16x128xbf16>
      tpu.vector_store %arg5[%c0_18, %c0_19], %25 {strides = array<i32>} : memref<16x128xbf16, #tpu.memory_space<vmem>>, vector<16x128xbf16>,
    } else {
    }
    return
  }
  func.func @transform_0(%arg0: i32, %arg1: i32) -> (i32, i32) {
    %c0_i32 = arith.constant 0 : i32
    %c0_i32_0 = arith.constant 0 : i32
    return %arg0, %c0_i32 : i32, i32
  }
  func.func @transform_1(%arg0: i32, %arg1: i32) -> (i32, i32) {
    %c0_i32 = arith.constant 0 : i32
    %c0_i32_0 = arith.constant 0 : i32
    return %c0_i32, %arg1 : i32, i32
  }
  func.func @transform_2(%arg0: i32, %arg1: i32) -> (i32, i32) {
    %c0_i32 = arith.constant 0 : i32
    %c0_i32_0 = arith.constant 0 : i32
    return %arg1, %c0_i32 : i32, i32
  }
  func.func @transform_3(%arg0: i32, %arg1: i32) -> (i32, i32) {
    %c0_i32 = arith.constant 0 : i32
    %c0_i32_0 = arith.constant 0 : i32
    return %arg0, %c0_i32 : i32, i32
  }
}

</mosaic_0001>

<bundles_post_ra>
// kernel: tpu_custom_call.1
= control target key start
LH: loop header
LB: loop body
LE: loop exit
PB: predicated region body
PF: predicated region fallthrough
CT: control target
= control target key end

     0   :  { %8 = vsyncpa [#allocation4], 0  ;;  %s945_s0 = inlined_call_operand.hbm [shape: bf16[16,128], index: 0, kind: input, shape index: {}]   ;;  %s946_s1 = inlined_call_operand.hbm [shape: bf16[128,512], index: 1, kind: input, shape index: {}]   ;;  %s947_s2 = inlined_call_operand.hbm [shape: bf16[256,128], index: 2, kind: input, shape index: {}]   ;;  %s948_s3 = inlined_call_operand.hbm [shape: bf16[16,128], index: 3, kind: output, shape index: {}]  }
   0x1   :  { %9 = vsyncpa [#allocation7], 0 }
   0x2   :  { %10 = vsyncpa [#allocation5], 0  ;;  %s859_s12 = smov [#allocation6]   ;;  %s765_s16 = scalar_lea.hbm %s946_s1, 4096 }
   0x3   :  { %s28_s13 = sshll.u32 %s859_s12, 4  ;;  %p766_p0 = scmp.ne.s32.totalorder %s946_s1, %s765_s16  ;;  %s29_s13 = int_to_ptr.vmem [resolvable:$true] %s28_s13 }
   0x4   :  { %p769_p1 = scmp.lt.u32.totalorder %s765_s16, %s946_s1 }
   0x6   :  { %p771_p2 = pnand %p769_p1, %p766_p0 }
   0x8   :  { %774 = shalt.err (!%p771_p2)
}
   0x9   :  { %s775_s21 = scalar_lea.vmem %s29_s13, 4096  ;;  %p780_p4 = scmp.lt.s32.totalorder %s29_s13, %s29_s13 }
   0xa   :  { %p776_p3 = scmp.ne.s32.totalorder %s29_s13, %s775_s21  ;;  %p781_p5 = scmp.lt.s32.totalorder %s775_s21, %s775_s21 }
   0xc   :  { %p782_p6 = por %p781_p5, %p780_p4 }
   0xe   :  { %p783_p7 = pnand %p782_p6, %p776_p3 }
  0x10   :  { %786 = shalt.err (!%p783_p7)
}
  0x11   :  { %s860_s22 = smov 256   ;;  %s861_s23 = smov 16  }
  0x12   :  { %34 = dma.hbm_to_vmem [thread:$0]  %s946_s1, 4096, %s29_s13, [#allocation7], %s860_s22, %s860_s22, %s861_s23  }
  0x13   :  { %s862_s26 = smov [#allocation3]   ;;  %s787_s30 = scalar_lea.hbm %s945_s0, 128 }
  0x14   :  { %s16_s27 = sshll.u32 %s862_s26, 4  ;;  %p788_p8 = scmp.ne.s32.totalorder %s945_s0, %s787_s30  ;;  %s17_s27 = int_to_ptr.vmem [resolvable:$true] %s16_s27 }
  0x15   :  { %p791_p9 = scmp.lt.u32.totalorder %s787_s30, %s945_s0 }
  0x17   :  { %p793_p10 = pnand %p791_p9, %p788_p8 }
  0x19   :  { %796 = shalt.err (!%p793_p10)
}
  0x1a   :  { %s797_s8 = scalar_lea.vmem %s17_s27, 128  ;;  %p802_p12 = scmp.lt.s32.totalorder %s17_s27, %s17_s27 }
  0x1b   :  { %p798_p11 = scmp.ne.s32.totalorder %s17_s27, %s797_s8  ;;  %p803_p13 = scmp.lt.s32.totalorder %s797_s8, %s797_s8 }
  0x1d   :  { %p804_p0 = por %p803_p13, %p802_p12 }
  0x1f   :  { %p805_p1 = pnand %p804_p0, %p798_p11 }
  0x21   :  { %808 = shalt.err (!%p805_p1)
}
  0x22   :  { %s863_s1 = smov 64   ;;  %s864_s9 = smov 4  }
  0x23   :  { %22 = dma.hbm_to_vmem [thread:$0]  %s945_s0, 128, %s17_s27, [#allocation4], %s863_s1, %s863_s1, %s864_s9  }
  0x24   :  { %s865_s12 = smov [#allocation8]   ;;  %s809_s16 = scalar_lea.hbm %s947_s2, 2048 }
  0x25   :  { %s40_s13 = sshll.u32 %s865_s12, 4  ;;  %p810_p2 = scmp.ne.s32.totalorder %s947_s2, %s809_s16  ;;  %s41_s13 = int_to_ptr.vmem [resolvable:$true] %s40_s13 }
  0x26   :  { %p813_p3 = scmp.lt.u32.totalorder %s809_s16, %s947_s2 }
  0x28   :  { %p815_p4 = pnand %p813_p3, %p810_p2 }
  0x2a   :  { %818 = shalt.err (!%p815_p4)
}
  0x2b   :  { %s819_s21 = scalar_lea.vmem %s41_s13, 2048  ;;  %p824_p6 = scmp.lt.s32.totalorder %s41_s13, %s41_s13 }
  0x2c   :  { %p820_p5 = scmp.ne.s32.totalorder %s41_s13, %s819_s21  ;;  %p825_p7 = scmp.lt.s32.totalorder %s819_s21, %s819_s21 }
  0x2e   :  { %p826_p8 = por %p825_p7, %p824_p6 }
  0x30   :  { %p827_p9 = pnand %p826_p8, %p820_p5 }
  0x32   :  { %830 = shalt.err (!%p827_p9)
}
  0x33   :  { %46 = dma.hbm_to_vmem [thread:$0]  %s947_s2, 2048, %s41_s13, [#allocation7], %s863_s1, %s863_s1, %s864_s9  }
  0x34   :  { %853 = dma.done.wait [#allocation4], 128  }
  0x35   :  { %854 = vsyncadd [#allocation4], 4294967168 }
  0x36   :  { %855 = dma.done.wait [#allocation7], 6144  }
  0x37   :  { %856 = vsyncadd [#allocation7], 4294961152  ;;  %v866_v0 = vmov 0   ;;  %v684_v1 = vld [vmem:[#allocation6 + $0x4] ss:$16 sps:$4 sm:$0xff]   ;;  %v714_v29 = vld [vmem:[#allocation3] sm:$0xff]  }
  0x38   :  { %199 = vmatprep.mubr.bf16.mxu0 %v866_v0  ;;  %338 = vmatprep.mubr.bf16.mxu1 %v866_v0  ;;  %v686_v2 = vld [vmem:[#allocation6] ss:$16 sps:$4 sm:$0xff]   ;;  %v687_v3 = vld [vmem:[#allocation6 + $0x24] ss:$16 sps:$4 sm:$0xff]   ;;  %v705_v8 = vld [vmem:[#allocation6 + $0xc] ss:$16 sps:$4 sm:$0xff]  }
  0x39   :  { %167 = vmatprep.subr.bf16.mxu0 %v684_v1  ;;  %v689_v4 = vld [vmem:[#allocation6 + $0x20] ss:$16 sps:$4 sm:$0xff]   ;;  %v690_v5 = vld [vmem:[#allocation6 + $0x44] ss:$16 sps:$4 sm:$0xff]   ;;  %v707_v9 = vld [vmem:[#allocation6 + $0x8] ss:$16 sps:$4 sm:$0xff]   ;;  %306 = vmatprep.subr.bf16.mxu1 %v705_v8 }
  0x3a   :  { %168 = vmatpush1.bf16.msra.mxu0 %v686_v2  ;;  %v692_v6 = vld [vmem:[#allocation6 + $0x40] ss:$16 sps:$4 sm:$0xff]   ;;  %v693_v7 = vld [vmem:[#allocation6 + $0x64] ss:$16 sps:$4 sm:$0xff]   ;;  %v711_v12 = vld [vmem:[#allocation6 + $0x2c] ss:$16 sps:$4 sm:$0xff]   ;;  %307 = vmatpush1.bf16.msra.mxu1 %v707_v9 }
  0x3b   :  { %169 = vmatprep.subr.bf16.mxu0 %v687_v3  ;;  %v695_v10 = vld [vmem:[#allocation6 + $0x60] ss:$16 sps:$4 sm:$0xff]   ;;  %v696_v11 = vld [vmem:[#allocation6 + $0x84] ss:$16 sps:$4 sm:$0xff]   ;;  %v713_v13 = vld [vmem:[#allocation6 + $0x28] ss:$16 sps:$4 sm:$0xff]   ;;  %308 = vmatprep.subr.bf16.mxu1 %v711_v12 }
  0x3c   :  { %v698_v14 = vld [vmem:[#allocation6 + $0x80] ss:$16 sps:$4 sm:$0xff]   ;;  %v715_v15 = vld [vmem:[#allocation6 + $0x4c] ss:$16 sps:$4 sm:$0xff]   ;;  %v699_v16 = vld [vmem:[#allocation6 + $0xa4] ss:$16 sps:$4 sm:$0xff]  }
  0x3d   :  { %v717_v17 = vld [vmem:[#allocation6 + $0x48] ss:$16 sps:$4 sm:$0xff]   ;;  %v718_v18 = vld [vmem:[#allocation6 + $0x6c] ss:$16 sps:$4 sm:$0xff]   ;;  %v701_v19 = vld [vmem:[#allocation6 + $0xa0] ss:$16 sps:$4 sm:$0xff]  }
  0x3e   :  { %170 = vmatpush1.bf16.msra.mxu0 %v689_v4  ;;  %309 = vmatpush1.bf16.msra.mxu1 %v713_v13  ;;  %v702_v20 = vld [vmem:[#allocation6 + $0xc4] ss:$16 sps:$4 sm:$0xff]   ;;  %v704_v21 = vld [vmem:[#allocation6 + $0xc0] ss:$16 sps:$4 sm:$0xff]   ;;  %v720_v22 = vld [vmem:[#allocation6 + $0x68] ss:$16 sps:$4 sm:$0xff]  }
  0x3f   :  { %171 = vmatprep.subr.bf16.mxu0 %v690_v5  ;;  %310 = vmatprep.subr.bf16.mxu1 %v715_v15  ;;  %v708_v23 = vld [vmem:[#allocation6 + $0xe4] ss:$16 sps:$4 sm:$0xff]   ;;  %v721_v24 = vld [vmem:[#allocation6 + $0x8c] ss:$16 sps:$4 sm:$0xff]   ;;  %v723_v25 = vld [vmem:[#allocation6 + $0x88] ss:$16 sps:$4 sm:$0xff]  }
  0x40   :  { %v724_v26 = vld [vmem:[#allocation6 + $0xac] ss:$16 sps:$4 sm:$0xff]   ;;  %v710_v27 = vld [vmem:[#allocation6 + $0xe0] ss:$16 sps:$4 sm:$0xff]   ;;  %v726_v28 = vld [vmem:[#allocation6 + $0xa8] ss:$16 sps:$4 sm:$0xff]  }
  0x41   :  { %v727_v30 = vld [vmem:[#allocation6 + $0xcc] ss:$16 sps:$4 sm:$0xff]   ;;  %v729_v31 = vld [vmem:[#allocation6 + $0xc8] ss:$16 sps:$4 sm:$0xff]   ;;  %v733_v34 = vld [vmem:[#allocation8 + $0x40] sm:$0xff]   ;;  %s867_s2 = smov [#allocation9]  }
  0x42   :  { %172 = vmatpush1.bf16.msra.mxu0 %v692_v6  ;;  %311 = vmatpush1.bf16.msra.mxu1 %v717_v17  ;;  %v730_v32 = vld [vmem:[#allocation6 + $0xec] ss:$16 sps:$4 sm:$0xff]   ;;  %v732_v33 = vld [vmem:[#allocation6 + $0xe8] ss:$16 sps:$4 sm:$0xff]   ;;  %v734_v35 = vld [vmem:[#allocation8] sm:$0xff]   ;;  %s578_s23 = sshll.u32 %s867_s2, 4  ;;  %s579_s23 = int_to_ptr.vmem [resolvable:$true] %s578_s23 }
  0x43   :  { %173 = vmatprep.subr.bf16.mxu0 %v693_v7  ;;  %312 = vmatprep.subr.bf16.mxu1 %v718_v18  ;;  %v735_v36 = vld [vmem:[#allocation8 + $0x48] sm:$0xff]   ;;  %v737_v38 = vld [vmem:[#allocation8 + $0x50] sm:$0xff]   ;;  %v739_v40 = vld [vmem:[#allocation8 + $0x58] sm:$0xff]   ;;  %s831_s24 = scalar_lea.vmem %s579_s23, 128  ;;  %p836_p11 = scmp.lt.s32.totalorder %s579_s23, %s579_s23 }
  0x44   :  { %v736_v37 = vld [vmem:[#allocation8 + $0x8] sm:$0xff]   ;;  %v738_v39 = vld [vmem:[#allocation8 + $0x10] sm:$0xff]   ;;  %v740_v41 = vld [vmem:[#allocation8 + $0x18] sm:$0xff]   ;;  %p832_p10 = scmp.ne.s32.totalorder %s579_s23, %s831_s24  ;;  %p837_p12 = scmp.lt.s32.totalorder %s831_s24, %s831_s24 }
  0x45   :  { %v741_v42 = vld [vmem:[#allocation8 + $0x60] sm:$0xff]   ;;  %v743_v44 = vld [vmem:[#allocation8 + $0x68] sm:$0xff]   ;;  %v745_v46 = vld [vmem:[#allocation8 + $0x70] sm:$0xff]  }
  0x46   :  { %174 = vmatpush1.bf16.msra.mxu0 %v695_v10  ;;  %313 = vmatpush1.bf16.msra.mxu1 %v720_v22  ;;  %v742_v43 = vld [vmem:[#allocation8 + $0x20] sm:$0xff]   ;;  %v744_v45 = vld [vmem:[#allocation8 + $0x28] sm:$0xff]   ;;  %v746_v47 = vld [vmem:[#allocation8 + $0x30] sm:$0xff]   ;;  %p838_p13 = por %p837_p12, %p836_p11 }
  0x47   :  { %175 = vmatprep.subr.bf16.mxu0 %v696_v11  ;;  %314 = vmatprep.subr.bf16.mxu1 %v721_v24  ;;  %v747_v48 = vld [vmem:[#allocation8 + $0x78] sm:$0xff]  }
  0x48   :  { %v748_v49 = vld [vmem:[#allocation8 + $0x38] sm:$0xff]   ;;  %p839_p0 = pnand %p838_p13, %p832_p10 }
  0x4a   :  { %176 = vmatpush1.bf16.msra.mxu0 %v698_v14  ;;  %315 = vmatpush1.bf16.msra.mxu1 %v723_v25 }
  0x4b   :  { %177 = vmatprep.subr.bf16.mxu0 %v699_v16  ;;  %316 = vmatprep.subr.bf16.mxu1 %v724_v26 }
  0x4e   :  { %178 = vmatpush1.bf16.msra.mxu0 %v701_v19  ;;  %317 = vmatpush1.bf16.msra.mxu1 %v726_v28 }
  0x4f   :  { %179 = vmatprep.subr.bf16.mxu0 %v702_v20  ;;  %318 = vmatprep.subr.bf16.mxu1 %v727_v30 }
  0x52   :  { %180 = vmatpush1.bf16.msra.mxu0 %v704_v21  ;;  %319 = vmatpush1.bf16.msra.mxu1 %v729_v31 }
  0x53   :  { %181 = vmatprep.subr.bf16.mxu0 %v708_v23  ;;  %320 = vmatprep.subr.bf16.mxu1 %v730_v32 }
  0x56   :  { %182 = vmatpush1.bf16.msra.mxu0 %v710_v27  ;;  %321 = vmatpush1.bf16.msra.mxu1 %v732_v33 }
  0x57   :  { %653 = vmatprep.subr.bf16.mxu0 %v733_v34 }
  0x59   :  { %200 = vmatmul.mubr.bf16.vlgmr.msra.gmra.mrb[0].mxu0 %v714_v29  ;;  %339 = vmatmul.mubr.bf16.vlgmr.msra.gmra.mrb[0].mxu1 %v714_v29 }
  0x5a   :  { %654 = vmatpush3.bf16.msra.mxu0 %v734_v35 }
  0x5b   :  { %655 = vmatprep.subr.bf16.mxu0 %v735_v36 }
  0x5e   :  { %656 = vmatpush3.bf16.msra.mxu0 %v736_v37 }
  0x5f   :  { %657 = vmatprep.subr.bf16.mxu0 %v737_v38 }
  0x62   :  { %658 = vmatpush3.bf16.msra.mxu0 %v738_v39 }
  0x63   :  { %659 = vmatprep.subr.bf16.mxu0 %v739_v40 }
  0x66   :  { %660 = vmatpush3.bf16.msra.mxu0 %v740_v41 }
  0x67   :  { %661 = vmatprep.subr.bf16.mxu0 %v741_v42 }
  0x6a   :  { %662 = vmatpush3.bf16.msra.mxu0 %v742_v43 }
  0x6b   :  { %663 = vmatprep.subr.bf16.mxu0 %v743_v44 }
  0x6e   :  { %664 = vmatpush3.bf16.msra.mxu0 %v744_v45 }
  0x6f   :  { %665 = vmatprep.subr.bf16.mxu0 %v745_v46 }
  0x72   :  { %666 = vmatpush3.bf16.msra.mxu0 %v746_v47 }
  0x73   :  { %667 = vmatprep.subr.bf16.mxu0 %v747_v48 }
  0x76   :  { %668 = vmatpush3.bf16.msra.mxu0 %v748_v49 }
 0x12c   :  { %v201_v50 = vpop.f32.mrb[0].mxu0  ;;  %v340_v58 = vpop.f32.mrb[0].mxu1 }
 0x12d   :  { %v624_v51 = vmul.f32 -1.442695, %v201_v50  ;;  %v203_v52 = vpop.f32.mrb[1].mxu0  ;;  %v342_v59 = vpop.f32.mrb[1].mxu1 }
 0x12e   :  { %v625_v53 = vmul.f32 -1.442695, %v203_v52  ;;  %v205_v54 = vpop.f32.mrb[2].mxu0  ;;  %v344_v60 = vpop.f32.mrb[2].mxu1 }
 0x12f   :  { %749 = vpow2.f32 %v624_v51  ;;  %v626_v55 = vmul.f32 -1.442695, %v205_v54  ;;  %v207_v56 = vpop.f32.mrb[3].mxu0  ;;  %v346_v62 = vpop.f32.mrb[3].mxu1 }
 0x130   :  { %751 = vpow2.f32 %v625_v53  ;;  %v627_v57 = vmul.f32 -1.442695, %v207_v56 }
 0x131   :  { %753 = vpow2.f32 %v626_v55 }
 0x132   :  { %755 = vpow2.f32 %v627_v57 }
 0x139   :  { %v750_v61 = vpop.eup %749 }
 0x13a   :  { %v752_v63 = vpop.eup %751  ;;  %v361_v0 = vadd.f32 1.0, %v750_v61 }
 0x13b   :  { %v754_v1 = vpop.eup %753  ;;  %v362_v2 = vadd.f32 1.0, %v752_v63 }
 0x13c   :  { %v756_v3 = vpop.eup %755  ;;  %757 = vrcp.f32 %v361_v0  ;;  %v363_v4 = vadd.f32 1.0, %v754_v1 }
 0x13d   :  { %759 = vrcp.f32 %v362_v2  ;;  %v364_v5 = vadd.f32 1.0, %v756_v3 }
 0x13e   :  { %761 = vrcp.f32 %v363_v4 }
 0x13f   :  { %763 = vrcp.f32 %v364_v5 }
 0x146   :  { %v758_v6 = vpop.eup %757 }
 0x147   :  { %v760_v7 = vpop.eup %759  ;;  %v373_v8 = vmul.f32 %v758_v6, %v201_v50 }
 0x148   :  { %v762_v9 = vpop.eup %761  ;;  %v374_v10 = vmul.f32 %v760_v7, %v203_v52 }
 0x149   :  { %v764_v11 = vpop.eup %763  ;;  %v375_v12 = vmul.f32 %v762_v9, %v205_v54  ;;  %v377_v13 = vmul.f32 %v373_v8, %v340_v58 }
 0x14a   :  { %v376_v14 = vmul.f32 %v764_v11, %v207_v56  ;;  %v378_v15 = vmul.f32 %v374_v10, %v342_v59 }
 0x14b   :  { %v379_v16 = vmul.f32 %v375_v12, %v344_v60 }
 0x14c   :  { %v380_v17 = vmul.f32 %v376_v14, %v346_v62 }
 0x14d   :  { %v383_v18 = vpack.c.bf16 %v379_v16, %v377_v13 }
 0x14e   :  { %v384_v19 = vpack.c.bf16 %v380_v17, %v378_v15 }
 0x150   :  { %545 = vmatprep.mubr.bf16.mxu0 %v384_v19 }
 0x151   :  { %546 = vmatmul.mubr.bf16.vlgmr.msra.gmra.mrb[4].mxu0 %v383_v18 }
 0x224   :  { %v669_v20 = vpop.f32.mrb[4].mxu0 }
 0x225   :  { %v670_v21 = vpop.f32.mrb[5].mxu0 }
 0x226   :  { %v671_v22 = vadd.f32 %v670_v21, %v669_v20  ;;  %v672_v23 = vpop.f32.mrb[6].mxu0 }
 0x227   :  { %v673_v24 = vpop.f32.mrb[7].mxu0 }
 0x228   :  { %v674_v25 = vadd.f32 %v673_v24, %v672_v23 }
 0x22a   :  { %v651_v26 = vpack.c.bf16 %v674_v25, %v671_v22 }
 0x22c   :  { %652 = vst [vmem:[#allocation9] sm:$0xff] %v651_v26  }
 0x22d   :  { %842 = shalt.err (!%p839_p0)
}
 0x22e   :  { %s843_s27 = scalar_lea.hbm %s948_s3, 128 }
 0x22f   :  { %p844_p1 = scmp.ne.s32.totalorder %s948_s3, %s843_s27  ;;  %p847_p2 = scmp.lt.u32.totalorder %s843_s27, %s948_s3 }
 0x231   :  { %p849_p3 = pnand %p847_p2, %p844_p1 }
 0x233   :  { %852 = shalt.err (!%p849_p3)
}
 0x234   :  { %584 = dma.vmem_to_hbm [thread:$0]  %s579_s23, 128, %s948_s3, [#allocation5], %s863_s1, %s863_s1, %s864_s9  }
 0x235   :  { %857 = dma.done.wait [#allocation5], 128  }
 0x236   :  { %858 = vsyncadd [#allocation5], 4294967168 }
 0x237   :  { %588 = vsyncpa [#allocation4], 1 }
 0x238   :  { %589 = vsyncpa [#allocation7], 1 }
 0x239   :  { %590 = vsyncpa [#allocation5], 1 }

</bundles_post_ra>
